<compile_context>
chip_gen: v7x
topology: tpu7x:2x2x1
jax: 0.10.0
libtpu: 0.0.40
codegen_flags: <defaults>
</compile_context>

<pallas_src>
import jax
import jax.numpy as jnp
from jax.experimental import pallas as pl
from jax.experimental.pallas import tpu as pltpu


def _kernel_impl(x_ref, wf_ref, bg_ref, ss_ref, o_ref):
    """Shared kernel body. ss_ref is None on the unconditioned path (static branch).

    x_ref:  (Bt, C_in, L)        raw input chunk
    wf_ref: (C_out, 3*C_in)      fused conv taps: Wf[o, k*C_in + c] = w[o, c, k]
    bg_ref: (C_out, 2) f32       [:, 0] = conv bias, [:, 1] = g * sqrt(C_out)
    ss_ref: (Bt, C_out, 2) f32   [:, :, 0] = scale + 1, [:, :, 1] = shift   (or None)
    o_ref:  (Bt, C_out, L)
    """
    bt, c_in, length = x_ref.shape
    wf = wf_ref[...]                                   # hoisted: loaded once per step
    bg = bg_ref[...]
    bias = bg[:, 0:1]                                  # (C_out, 1)
    gain = bg[:, 1:2]                                  # g * sqrt(C_out)
    zcol = jnp.zeros((c_in, 1), x_ref.dtype)           # hoisted (broadcasts are not CSE'd)

    for bi in range(bt):                               # bt is a small compile-time constant
        x = x_ref[bi]                                  # (C_in, L)
        # Stacked conv operand S[k*C_in + c, l] = x[c, l + k - 1] (zero halo built in VMEM).
        s = jnp.concatenate(
            [jnp.concatenate([zcol, x[:, : length - 1]], axis=1),   # tap 0: x[:, l-1]
             x,                                                     # tap 1: x[:, l]
             jnp.concatenate([x[:, 1:], zcol], axis=1)],            # tap 2: x[:, l+1]
            axis=0)                                                 # (3*C_in, L)

        # Single MXU matmul with 3x contraction depth; f32 accumulation.
        y = jnp.dot(wf, s, preferred_element_type=jnp.float32) + bias        # (C_out, L)

        # RMSNorm over channels: one rsqrt per lane column (eps applied to sum-of-squares).
        inv = jax.lax.rsqrt(jnp.maximum(jnp.sum(y * y, axis=0, keepdims=True), 1e-24))
        y = y * inv
        if ss_ref is None:
            y = y * gain
        else:
            ss = ss_ref[bi]                            # (C_out, 2)
            y = y * (gain * ss[:, 0:1]) + ss[:, 1:2]   # gain folded into the FiLM scale

        y = y * jax.nn.sigmoid(y)                      # SiLU
        o_ref[bi] = y.astype(o_ref.dtype)


def _block_kernel(x_ref, wf_ref, bg_ref, o_ref):
    _kernel_impl(x_ref, wf_ref, bg_ref, None, o_ref)


def _block_kernel_film(x_ref, wf_ref, bg_ref, ss_ref, o_ref):
    _kernel_impl(x_ref, wf_ref, bg_ref, ss_ref, o_ref)


def _pick_batch_tile(batch, c_in, c_out, length, itemsize):
    """Largest divisor of `batch` whose working set fits a VMEM budget; prefer >= 2
    grid steps (v7x has 2 TensorCores, and >= 2 steps lets the pipeline overlap)."""
    def footprint(bt):
        io = 2 * bt * (c_in + c_out) * length * itemsize       # double-buffered in/out blocks
        work = bt * (3 * c_in + 3 * c_out) * length * 4        # stacked operand + f32 temps
        params = 3 * c_out * c_in * itemsize + 6 * c_out * 4
        return io + work + params

    budget = 20 << 20
    divisors = [d for d in range(1, batch + 1) if batch % d == 0]
    fitting = [d for d in divisors if footprint(d) <= budget] or [1]
    if batch >= 2:
        pref = [d for d in fitting if batch // d >= 2]
        bt = max(pref) if pref else max(fitting)
    else:
        bt = max(fitting)
    return bt, footprint(bt)


def block_forward(x, w, b, g, scale_shift=None):
    """Fused Conv1d(k=3, pad=1) + RMSNorm + optional FiLM (scale, shift) + SiLU.

    x: (B, C_in, L); w: (C_out, C_in, 3); b: (C_out,); g: (C_out,) or (1, C_out, 1).
    scale_shift: None or (scale, shift), each broadcastable to (B, C_out, 1).
    """
    B, C_in, L = x.shape
    C_out = w.shape[0]
    assert w.shape == (C_out, C_in, 3)

    dt = x.dtype
    # Fused conv weight: Wf[o, k*C_in + c] = w[o, c, k]  -> one K = 3*C_in contraction.
    wf = jnp.transpose(w, (0, 2, 1)).reshape(C_out, 3 * C_in).astype(dt)
    # Pack conv bias and RMSNorm gain (sqrt(C_out) folded in) into one tiny f32 array.
    b1 = jnp.asarray(b, jnp.float32).reshape(C_out)
    g1 = jnp.asarray(g, jnp.float32).reshape(C_out) * (float(C_out) ** 0.5)
    bg = jnp.stack([b1, g1], axis=-1)                          # (C_out, 2)

    itemsize = jnp.dtype(dt).itemsize
    Bt, fp = _pick_batch_tile(B, C_in, C_out, L, itemsize)
    grid = (B // Bt,)
    # TODO(synk): add an L-tiling grid axis (overlapping +/-1-column halo) for the case
    # where even a single sample's (C, L) slabs exceed the VMEM budget (very long L on
    # v7x's 64 MiB VMEM); the current grid splits over batch only.

    vmem_limit = int(min(max(fp + (4 << 20), 32 << 20), 48 << 20))

    out_shape = jax.ShapeDtypeStruct((B, C_out, L), dt)
    x_spec = pl.BlockSpec((Bt, C_in, L), lambda i: (i, 0, 0))
    wf_spec = pl.BlockSpec((C_out, 3 * C_in), lambda i: (0, 0))   # resident across grid
    bg_spec = pl.BlockSpec((C_out, 2), lambda i: (0, 0))          # resident across grid
    o_spec = pl.BlockSpec((Bt, C_out, L), lambda i: (i, 0, 0))
    cparams = pltpu.CompilerParams(
        dimension_semantics=("parallel",), vmem_limit_bytes=vmem_limit)

    if scale_shift is None:
        # Specialized unconditioned path: no dummy FiLM inputs, no FiLM math in-kernel.
        return pl.pallas_call(
            _block_kernel,
            out_shape=out_shape,
            grid_spec=pltpu.PrefetchScalarGridSpec(
                num_scalar_prefetch=0, grid=grid,
                in_specs=[x_spec, wf_spec, bg_spec], out_specs=o_spec),
            compiler_params=cparams,
        )(x, wf, bg)

    scale, shift = scale_shift
    scale = jnp.broadcast_to(jnp.asarray(scale, jnp.float32), (B, C_out, 1))
    shift = jnp.broadcast_to(jnp.asarray(shift, jnp.float32), (B, C_out, 1))
    ss = jnp.concatenate([scale + 1.0, shift], axis=-1)           # (B, C_out, 2)
    ss_spec = pl.BlockSpec((Bt, C_out, 2), lambda i: (i, 0, 0))
    return pl.pallas_call(
        _block_kernel_film,
        out_shape=out_shape,
        grid_spec=pltpu.PrefetchScalarGridSpec(
            num_scalar_prefetch=0, grid=grid,
            in_specs=[x_spec, wf_spec, bg_spec, ss_spec], out_specs=o_spec),
        compiler_params=cparams,
    )(x, wf, bg, ss)


class Block:
    """JAX/Pallas port of unet1d.Block (Conv1d k=3 p=1 -> RMSNorm -> [FiLM] -> SiLU)."""

    def __init__(self, dim, dim_out, key, dtype=jnp.float32):
        kw, kb = jax.random.split(key)
        bound = 1.0 / ((dim * 3) ** 0.5)            # PyTorch Conv1d default init range
        self.w = jax.random.uniform(kw, (dim_out, dim, 3), dtype, -bound, bound)
        self.b = jax.random.uniform(kb, (dim_out,), dtype, -bound, bound)
        self.g = jnp.ones((dim_out,), dtype)        # RMSNorm.g (torch shape (1, dim_out, 1))

    def __call__(self, x, scale_shift=None):
        return block_forward(x, self.w, self.b, self.g, scale_shift)


def block_reference(x, w, b, g, scale_shift=None):
    """Pure-JAX reference matching the PyTorch Block forward."""
    B, C_in, L = x.shape
    C_out = w.shape[0]
    xp = jnp.pad(x, ((0, 0), (0, 0), (1, 1)))
    y = jnp.zeros((B, C_out, L), jnp.float32) + jnp.asarray(b, jnp.float32).reshape(1, C_out, 1)
    for k in range(3):
        y = y + jnp.einsum("oc,bcl->bol",
                           w[:, :, k].astype(jnp.float32),
                           xp[:, :, k:k + L].astype(jnp.float32),
                           precision=jax.lax.Precision.HIGHEST)
    nrm = jnp.sqrt(jnp.sum(y * y, axis=1, keepdims=True))
    y = y / jnp.maximum(nrm, 1e-12)
    y = y * jnp.asarray(g, jnp.float32).reshape(1, C_out, 1) * (C_out ** 0.5)
    if scale_shift is not None:
        scale, shift = scale_shift
        y = y * (jnp.asarray(scale, jnp.float32) + 1.0) + jnp.asarray(shift, jnp.float32)
    y = y * jax.nn.sigmoid(y)
    return y.astype(x.dtype)


if __name__ == "__main__":
    key = jax.random.PRNGKey(0)
    k1, k2, k3, k4 = jax.random.split(key, 4)

    B, dim, dim_out, L = 2, 8, 16, 48               # L=48 exercises the masked-tail store path
    x = jax.random.normal(k1, (B, dim, L), jnp.float32)
    blk = Block(dim, dim_out, key=k2)

    # Snap inputs/weights to the bf16 grid so MXU-pass precision differences
    # between the Pallas matmul and the XLA reference don't affect the check.
    x = x.astype(jnp.bfloat16).astype(jnp.float32)
    blk.w = blk.w.astype(jnp.bfloat16).astype(jnp.float32)
    blk.b = blk.b.astype(jnp.bfloat16).astype(jnp.float32)

    # Path 1: scale_shift=None (specialized kernel, no FiLM inputs)
    out = jax.block_until_ready(blk(x))
    ref = block_reference(x, blk.w, blk.b, blk.g)
    assert out.shape == (B, dim_out, L) and out.dtype == x.dtype
    assert jnp.allclose(out, ref, atol=1e-3, rtol=1e-3), \
        float(jnp.max(jnp.abs(out - ref)))

    # Path 2: FiLM-style scale/shift conditioning, shapes (B, dim_out, 1)
    scale = 0.1 * jax.random.normal(k3, (B, dim_out, 1), jnp.float32)
    shift = 0.1 * jax.random.normal(k4, (B, dim_out, 1), jnp.float32)
    out2 = jax.block_until_ready(blk(x, (scale, shift)))
    ref2 = block_reference(x, blk.w, blk.b, blk.g, (scale, shift))
    assert jnp.allclose(out2, ref2, atol=1e-3, rtol=1e-3), \
        float(jnp.max(jnp.abs(out2 - ref2)))

    # Path 3: broadcastable FiLM inputs, shape (1, dim_out, 1) with B > 1
    scale_b = scale[:1]
    shift_b = shift[:1]
    out3 = jax.block_until_ready(blk(x, (scale_b, shift_b)))
    ref3 = block_reference(x, blk.w, blk.b, blk.g, (scale_b, shift_b))
    assert jnp.allclose(out3, ref3, atol=1e-3, rtol=1e-3), \
        float(jnp.max(jnp.abs(out3 - ref3)))

    print("KERNEL_OK")
</pallas_src>

<mosaic_0001>
module attributes {stable_mosaic.version = 11 : i64} {
  func.func @_block_kernel(%arg0: i32, %arg1: memref<1x8x48xf32, #tpu.memory_space<vmem>>, %arg2: memref<16x24xf32, #tpu.memory_space<vmem>>, %arg3: memref<16x2xf32, #tpu.memory_space<vmem>>, %arg4: memref<1x16x48xf32, #tpu.memory_space<vmem>>) attributes {dimension_semantics = [#tpu.dimension_semantics<parallel>], iteration_bounds = array<i64: 2>, scalar_prefetch = 0 : i64, scratch_operands = 0 : i64, tpu.core_type = #tpu.core_type<tc>, window_params = [{transform_indices = @transform_0, window_bounds = array<i64: 1, 8, 48>}, {pipeline_mode = #tpu.pipeline_mode<synchronous>, transform_indices = @transform_1, window_bounds = array<i64: 16, 24>}, {pipeline_mode = #tpu.pipeline_mode<synchronous>, transform_indices = @transform_2, window_bounds = array<i64: 16, 2>}, {transform_indices = @transform_3, window_bounds = array<i64: 1, 16, 48>}]} {
    %c0 = arith.constant 0 : index
    %c0_0 = arith.constant 0 : index
    %0 = vector.load %arg2[%c0, %c0_0] : memref<16x24xf32, #tpu.memory_space<vmem>>, vector<16x24xf32>
    %c0_1 = arith.constant 0 : index
    %c0_2 = arith.constant 0 : index
    %1 = vector.load %arg3[%c0_1, %c0_2] : memref<16x2xf32, #tpu.memory_space<vmem>>, vector<16x2xf32>
    %2 = vector.extract_strided_slice %1 {offsets = [0, 0], sizes = [16, 1], strides = [1, 1]} : vector<16x2xf32> to vector<16x1xf32>
    %3 = vector.extract_strided_slice %1 {offsets = [0, 1], sizes = [16, 1], strides = [1, 1]} : vector<16x2xf32> to vector<16x1xf32>
    %cst = arith.constant 0.000000e+00 : f32
    %4 = vector.broadcast %cst : f32 to vector<8x1xf32>
    %c0_3 = arith.constant 0 : index
    %c0_4 = arith.constant 0 : index
    %c0_5 = arith.constant 0 : index
    %5 = vector.load %arg1[%c0_3, %c0_4, %c0_5] : memref<1x8x48xf32, #tpu.memory_space<vmem>>, vector<1x8x48xf32>
    %6 = vector.shape_cast %5 : vector<1x8x48xf32> to vector<8x48xf32>
    %7 = vector.extract_strided_slice %6 {offsets = [0, 0], sizes = [8, 47], strides = [1, 1]} : vector<8x48xf32> to vector<8x47xf32>
    %8 = tpu.concatenate %4, %7 in 1 : vector<8x1xf32>, vector<8x47xf32> -> vector<8x48xf32>
    %9 = vector.extract_strided_slice %6 {offsets = [0, 1], sizes = [8, 47], strides = [1, 1]} : vector<8x48xf32> to vector<8x47xf32>
    %10 = tpu.concatenate %9, %4 in 1 : vector<8x47xf32>, vector<8x1xf32> -> vector<8x48xf32>
    %11 = tpu.concatenate %8, %6, %10 in 0 : vector<8x48xf32>, vector<8x48xf32>, vector<8x48xf32> -> vector<24x48xf32>
    %cst_6 = arith.constant dense<0.000000e+00> : vector<16x48xf32>
    %12 = tpu.matmul %0, %11, %cst_6 {dimension_numbers = #tpu.dot_dimension_numbers<[1], [0], [0], [1], [0, 0, 1, 1], [], []>} : vector<16x24xf32>, vector<24x48xf32>, vector<16x48xf32> -> vector<16x48xf32>
    %13 = vector.broadcast %2 : vector<16x1xf32> to vector<16x48xf32>
    %14 = arith.addf %12, %13 : vector<16x48xf32>
    %15 = arith.mulf %14, %14 : vector<16x48xf32>
    %cst_7 = arith.constant dense<0.000000e+00> : vector<48xf32>
    %16 = vector.multi_reduction <add>, %15, %cst_7 [0] : vector<16x48xf32> to vector<48xf32>
    %17 = vector.shape_cast %16 : vector<48xf32> to vector<1x48xf32>
    %cst_8 = arith.constant 1.000000e-24 : f32
    %18 = vector.broadcast %cst_8 : f32 to vector<1x48xf32>
    %19 = arith.maximumf %17, %18 : vector<1x48xf32>
    %20 = math.rsqrt %19 : vector<1x48xf32>
    %21 = vector.broadcast %20 : vector<1x48xf32> to vector<16x48xf32>
    %22 = arith.mulf %14, %21 : vector<16x48xf32>
    %23 = vector.broadcast %3 : vector<16x1xf32> to vector<16x48xf32>
    %24 = arith.mulf %22, %23 : vector<16x48xf32>
    %25 = arith.negf %24 : vector<16x48xf32>
    %26 = math.exp %25 : vector<16x48xf32>
    %cst_9 = arith.constant 1.000000e+00 : f32
    %27 = vector.broadcast %cst_9 : f32 to vector<16x48xf32>
    %28 = arith.addf %27, %26 : vector<16x48xf32>
    %29 = arith.divf %27, %28 : vector<16x48xf32>
    %30 = arith.mulf %24, %29 : vector<16x48xf32>
    %c0_10 = arith.constant 0 : index
    %c0_11 = arith.constant 0 : index
    %c0_12 = arith.constant 0 : index
    %31 = vector.load %arg4[%c0_10, %c0_11, %c0_12] : memref<1x16x48xf32, #tpu.memory_space<vmem>>, vector<1x16x48xf32>
    %32 = vector.shape_cast %31 : vector<1x16x48xf32> to vector<16x48xf32>
    %33 = vector.shape_cast %30 : vector<16x48xf32> to vector<1x16x48xf32>
    tpu.vector_store %arg4[%c0_10, %c0_11, %c0_12], %33 {strides = array<i32>} : memref<1x16x48xf32, #tpu.memory_space<vmem>>, vector<1x16x48xf32>,
    return
  }
  func.func @transform_0(%arg0: i32) -> (i32, i32, i32) {
    %c0_i32 = arith.constant 0 : i32
    %c0_i32_0 = arith.constant 0 : i32
    %c0_i32_1 = arith.constant 0 : i32
    return %arg0, %c0_i32, %c0_i32_0 : i32, i32, i32
  }
  func.func @transform_1(%arg0: i32) -> (i32, i32) {
    %c0_i32 = arith.constant 0 : i32
    %c0_i32_0 = arith.constant 0 : i32
    %c0_i32_1 = arith.constant 0 : i32
    return %c0_i32, %c0_i32_0 : i32, i32
  }
  func.func @transform_2(%arg0: i32) -> (i32, i32) {
    %c0_i32 = arith.constant 0 : i32
    %c0_i32_0 = arith.constant 0 : i32
    %c0_i32_1 = arith.constant 0 : i32
    return %c0_i32, %c0_i32_0 : i32, i32
  }
  func.func @transform_3(%arg0: i32) -> (i32, i32, i32) {
    %c0_i32 = arith.constant 0 : i32
    %c0_i32_0 = arith.constant 0 : i32
    %c0_i32_1 = arith.constant 0 : i32
    return %arg0, %c0_i32, %c0_i32_0 : i32, i32, i32
  }
}

</mosaic_0001>

<bundles_post_ra>
// kernel: tpu_custom_call.1
= control target key start
LH: loop header
LB: loop body
LE: loop exit
PB: predicated region body
PF: predicated region fallthrough
CT: control target
= control target key end

     0   :  { %8 = vsyncpa [#allocation3], 0  ;;  %s809_s0 = inlined_call_operand.vmem [shape: f32[2,8,48], index: 0, kind: input, shape index: {}]   ;;  %s810_s1 = inlined_call_operand.hbm [shape: f32[16,24], index: 1, kind: input, shape index: {}]   ;;  %s811_s2 = inlined_call_operand.vmem [shape: f32[16,2], index: 2, kind: input, shape index: {}]   ;;  %s812_s3 = inlined_call_operand.hbm [shape: f32[2,16,48], index: 3, kind: output, shape index: {}]  }
   0x1   :  { %9 = vsyncpa [#allocation4], 0 }
   0x2   :  { %11 = vsyncpa [#allocation4 + $0x1], 0  ;;  %s659_s12 = smov 0   ;;  %s661_s13 = smov 0  }
   0x3   :  { %s663_s14 = smov 0   ;;  %s665_s15 = smov 0  }
   0x4 LB: > { %s680_s16 = sadd.s32 4294967295, %s626_s15   ;;  %s419_s17 = sadd.s32 4294967294, %s626_s15   ;;  %s626_s15 = sphi %s665_s15, %s828_s15   ;;  %s622_s14 = sphi %s663_s14, %s827_s14   ;;  %s618_s13 = sphi %s661_s13, %s826_s13   ;;  %s614_s12 = sphi %s659_s12, %s825_s12  }
   0x5   : > { %s684_s18 = sadd.s32 1, %s626_s15   ;;  %s92_s19 = sadd.s32 1, %s622_s14 }
   0x6   : > { %s89_s20 = ssub.s32 %s626_s15, %s684_s18  ;;  %p102_p0 = scmp.ne.s32.totalorder %s622_s14, %s618_s13 }
   0x7   : > { %p90_p1 = scmp.eq.s32.totalorder %s89_s20, 0  ;;  %p103_p2 = scmp.eq.s32.totalorder %s680_s16, 1 }
   0x8   : > { %p108_p3 = scmp.ne.s32.totalorder %s618_s13, %s614_s12  ;;  %p109_p4 = scmp.eq.s32.totalorder %s419_s17, 1 }
   0x9   : > { %s695_s21 = scalar_select %p90_p1, %s622_s14, %s92_s19  }
   0xa   : > { %p697_p5 = por %p103_p2, %p102_p0  ;;  %p701_p6 = por %p109_p4, %p108_p3 }
   0xb   : > { %p420_p7 = scmp.ge.s32.totalorder %s626_s15, 1  ;;  %p116_p8 = scmp.lt.s32.totalorder %s626_s15, 3 }
   0xc   : > { %s816_s22 = scalar_select %p697_p5, 1, 0 }
   0xd   : > { %s817_s23 = scalar_select %p701_p6, 1, 0 }
   0xe   : > { %p813_p9 = scmp.eq.s32.totalorder %s680_s16, 0  ;;  %p708_p10 = pnand %p420_p7, %p116_p8 }
   0xf   : > { %s628_s25 = smov [#allocation2]   ;;  %s532_s30 = scalar_lea.hbm %s810_s1, 256 }
  0x10   : > { %s818_s24 = scalar_select %p708_p10, 1, 0 }
  0x11   : > { %s128_s26 = sshll.u32 %s628_s25, 4  ;;  %p466_p11 = pneg %p708_p10  ;;  %s129_s26 = int_to_ptr.vmem [resolvable:$true] %s128_s26 }
  0x12   : > { %p533_p13 = scmp.ne.s32.totalorder %s810_s1, %s532_s30  ;;  %p539_p3 = scmp.lt.u32.totalorder %s532_s30, %s810_s1 }
  0x13   : > { %p716_p12 = pnand %p813_p9, %p466_p11 }
  0x15   : > { %p534_p0 = pneg %p716_p12 }
  0x17   : > { %p535_p1 = pnand %p534_p0, %p533_p13 }
  0x19   : > { %p536_p2 = pneg %p535_p1 }
  0x1b   : > { %p541_p4 = pnand %p539_p3, %p536_p2 }
  0x1d   : > { %544 = shalt.err (!%p541_p4)
}
  0x1e   : > { %s545_s8 = scalar_lea.vmem %s129_s26, 256  ;;  %p553_p9 = scmp.lt.s32.totalorder %s129_s26, %s129_s26 }
  0x1f   : > { %p546_p7 = scmp.ne.s32.totalorder %s129_s26, %s545_s8  ;;  %p554_p6 = scmp.lt.s32.totalorder %s545_s8, %s545_s8 }
  0x21   : > { %p548_p8 = pnand %p546_p7, %p534_p0  ;;  %p555_p5 = por %p554_p6, %p553_p9 }
  0x23   : > { %p549_p11 = pneg %p548_p8 }
  0x25   : > { %p556_p10 = pnand %p555_p5, %p549_p11 }
  0x27   : > { %559 = shalt.err (!%p556_p10)
}
  0x28   : > { %s629_s9 = smov 128   ;;  %s630_s10 = smov 8  }
  0x29   : > { %469 = dma.hbm_to_vmem [thread:$0]  (!%p716_p12), %s810_s1, 256, %s129_s26, [#allocation3], %s629_s9, %s629_s9, %s630_s10  }
  0x2a   : > { %p820_p13 = scmp.ne.s32.totalorder %s818_s24, 0 }
  0x2b   : > { %p821_p1 = scmp.eq.s32.totalorder (!%p820_p13), %s680_s16, 0 }
  0x2c   : > { %154 = sbr.rel (%p820_p13) target bundleno = 475 (0x1db), region = 32 }
  0x33   : > { %605 = dma.done.wait (%p821_p1), [#allocation3], 256   ;;  %p822_p0 = pmov %p821_p1 }
  0x34   : > { %p177_p5 = scmp.lt.s32.totalorder %s680_s16, 1  ;;  %v631_v0 = vmov 0   ;;  %v632_v1 = vmov 1   ;;  %vm207_vm0 = vcmask 195584   ;;  %v181_v3 = vld [vmem:[#allocation2] sm:$0xff]  ;;  %s633_s27 = smov 1  }
  0x35   : > { %607 = vsyncadd (%p822_p0), [#allocation3], 4294967040  ;;  %519 = vset.pattern.permute.xlu1 %v631_v0  ;;  %520 = vset.pattern.permute.xlu0 %v632_v1  ;;  %v183_v4 = vld [vmem:[%s811_s2] sm:$0xff]  ;;  %v184_v5 = vld [vmem:[%s811_s2 + $0x8] sm:$0xff]  ;;  %s634_s5 = smov 127   ;;  %vm190_vm1 = vcmask 7168  }
  0x36   : > { %s178_s19 = scalar_select %p177_p5, %s680_s16, 1  ;;  %451 = vmatprep.mubr.msk.f32.mxu0 %vm207_vm0, %v181_v3  ;;  %199 = vperm.xlu1 %519, %v183_v4   ;;  %vm427_vm2 = vmneg %vm190_vm1  ;;  %vm635_vm3 = vmmov 1   ;;  %vm195_vm5 = vcmask 384000   ;;  %v182_v9 = vld [vmem:[#allocation2 + $0x8] sm:$0xff]  ;;  %vm291_vm6 = vcmask 392192  }
  0x37   : > { %vm455_vm4 = vmpackc.low %vm635_vm3, %vm427_vm2  ;;  %s174_s6 = sand.u32 1, %s618_s13   ;;  %s439_s8 = sshll.u32 %s680_s16, 8 }
  0x38   : > { %s426_s20 = sshll.u32 %s178_s19, 3  ;;  %s425_s7 = sshll.u32 %s174_s6, 4 }
  0x39   : > { %s180_s24 = scalar_lea.vmem %s809_s0, %s426_s20  ;;  %s176_s9 = scalar_lea.vmem [#allocation5], %s425_s7 }
  0x3a   : > { %v185_v2 = vld [vmem:[%s180_s24] sm:$0xff]  ;;  %204 = vperm.xlu1 %519, %v184_v5   ;;  %s345_s10 = sshll.u32 %s176_s9, 4  ;;  %s762_s19 = scalar_lea.hbm %s812_s3, %s439_s8  ;;  %s764_s10 = int_to_ptr.vmem [resolvable:$true] %s345_s10 }
  0x3b   : > { %187 = vrot.lane.b32.xlu0 %v185_v2, %s633_s27  ;;  %s768_s16 = scalar_lea.sflag [#allocation4], %s174_s6  ;;  %s560_s20 = scalar_lea.vmem %s764_s10, 256 }
  0x3c   : > { %p561_p6 = scmp.ne.s32.totalorder %s764_s10, %s560_s20  ;;  %p823_p9 = scmp.ne.s32.totalorder %s816_s22, 0 }
  0x3d   : > { %s636_s25 = smov [#allocation5]  }
  0x3e   : > { %521 = vset.pattern.permute.xlu1 %v632_v1  ;;  %p562_p10 = pnand %p561_p6, %p823_p9  ;;  %s564_s26 = sshll.u32 %s636_s25, 4  ;;  %s565_s26 = int_to_ptr.vmem [resolvable:$false] %s564_s26 }
  0x3f   : > { %192 = vrot.lane.b32.xlu0 %v185_v2, %s634_s5  ;;  %310 = vperm.xlu1 %521, %v184_v5   ;;  %s566_s24 = scalar_lea.vmem %s565_s26, 512  ;;  %p567_p2 = scmp.lt.s32.totalorder %s764_s10, %s565_s26 }
  0x40   : > { %p563_p12 = pneg %p562_p10  ;;  %p568_p3 = scmp.lt.s32.totalorder %s566_s24, %s560_s20 }
  0x42   : > { %p569_p4 = por %p568_p3, %p567_p2 }
  0x43   : > { %306 = vperm.xlu0 %520, %v183_v4  }
  0x44   : > { %p570_p7 = pnand %p569_p4, %p563_p12 }
  0xad   : > { %v188_v6 = vpop.permute.xlu0 %187 }
  0xae   : > { %v454_v7 = vpack.c.bf16 %v185_v2, %v188_v6 }
  0xb0   : > { %456 = vmatprep.subr.msk.bf16.mxu0 %vm455_vm4, %v454_v7 }
  0xb1   : > { %459 = vmatpush3.bf16.msk.msra.mxu0 %vm455_vm4, %v454_v7  ;;  %v193_v8 = vpop.permute.xlu0 %192 }
  0xb2   : > { %449 = vmatprep.subr.msk.mxu0 %vm195_vm5, %v193_v8 }
  0xb5   : > { %450 = vmatpush3.msk.msra.mxu0 %vm195_vm5, %v193_v8  ;;  %v200_v10 = vpop.permute.xlu1 %199 }
  0xb6   : > { %452 = vmatmul.mubr.msk.f32.vlgmr.msra.gmra.mrb[0].mxu0 %vm207_vm0, %v182_v9 }
  0xb9   : > { %v205_v11 = vpop.permute.xlu1 %204 }
  0xbe   : > { %v311_v30 = vpop.permute.xlu1 %310 }
  0xc2   : > { %v307_v29 = vpop.permute.xlu0 %306 }
 0x189   : > { %v453_v12 = vpop.f32.mrb[0].mxu0 }
 0x18a   : > { %v286_v13 = vadd.f32 %v453_v12, %v205_v11  ;;  %v280_v14 = vpop.f32.mrb[1].mxu0 }
 0x18b   : > { %v281_v15 = vadd.f32 %v280_v14, %v200_v10 }
 0x18c   : > { %v290_v16 = vmul.f32 %v286_v13, %v286_v13 }
 0x18d   : > { %v289_v17 = vmul.f32 %v281_v15, %v281_v15 }
 0x18e   : > { %v293_v18 = vsel %vm291_vm6, %v290_v16, 0.0 }
 0x18f   : > { %v292_v19 = vsel %vm291_vm6, %v289_v17, 0.0 }
 0x190   : > { %v294_v20 = vadd.f32 %v293_v18, %v292_v19 }
 0x192   : > { %v295_v21 = vrot.slane %v294_v20, 4 }
 0x194   : > { %v296_v22 = vadd.f32 %v295_v21, %v294_v20 }
 0x196   : > { %v297_v23 = vrot.slane %v296_v22, 2 }
 0x198   : > { %v298_v24 = vadd.f32 %v297_v23, %v296_v22 }
 0x19a   : > { %v299_v25 = vrot.slane %v298_v24, 1 }
 0x19c   : > { %v300_v26 = vadd.f32 %v299_v25, %v298_v24 }
 0x19e   : > { %v301_v27 = vmax.f32 %v300_v26, 1e-24 }
 0x1a0   : > { %522 = vrsqrt.f32 %v301_v27 }
 0x1aa   : > { %v523_v28 = vpop.eup %522 }
 0x1ab   : > { %v303_v31 = vmul.f32 %v523_v28, %v281_v15  ;;  %v304_v32 = vmul.f32 %v523_v28, %v286_v13 }
 0x1ad   : > { %v313_v33 = vmul.f32 %v307_v29, %v303_v31  ;;  %v314_v34 = vmul.f32 %v311_v30, %v304_v32 }
 0x1af   : > { %v432_v35 = vmul.f32 -1.442695, %v313_v33  ;;  %v433_v36 = vmul.f32 -1.442695, %v314_v34 }
 0x1b1   : > { %524 = vpow2.f32 %v432_v35 }
 0x1b2   : > { %526 = vpow2.f32 %v433_v36 }
 0x1bb   : > { %v525_v37 = vpop.eup %524 }
 0x1bc   : > { %v527_v38 = vpop.eup %526  ;;  %v321_v39 = vadd.f32 1.0, %v525_v37 }
 0x1bd   : > { %v322_v40 = vadd.f32 1.0, %v527_v38 }
 0x1be   : > { %528 = vrcp.f32 %v321_v39 }
 0x1bf   : > { %530 = vrcp.f32 %v322_v40 }
 0x1c8   : > { %v529_v41 = vpop.eup %528 }
 0x1c9   : > { %v531_v42 = vpop.eup %530  ;;  %v327_v43 = vmul.f32 %v529_v41, %v313_v33 }
 0x1ca   : > { %v328_v44 = vmul.f32 %v531_v42, %v314_v34 }
 0x1cb   : > { %329 = vst.msk [vmem:[%s176_s9] sm:$0xff] %vm291_vm6, %v327_v43 }
 0x1cc   : > { %330 = vst.msk [vmem:[%s176_s9 + $0x8] sm:$0xff] %vm291_vm6, %v328_v44 }
 0x1cd   : > { %573 = shalt.err (!%p570_p7)
}
 0x1ce   : > { %s574_s27 = scalar_lea.hbm %s762_s19, 256  ;;  %s578_s30 = scalar_lea.hbm %s812_s3, 512 }
 0x1cf   : > { %p575_p8 = scmp.ne.s32.totalorder %s762_s19, %s574_s27  ;;  %p579_p1 = scmp.lt.u32.totalorder %s762_s19, %s812_s3 }
 0x1d0   : > { %p580_p0 = scmp.lt.u32.totalorder %s578_s30, %s574_s27  ;;  %p582_p6 = scmp.lt.u32.totalorder %s574_s27, %s762_s19 }
 0x1d1   : > { %p576_p11 = pnand %p575_p8, %p823_p9 }
 0x1d2   : > { %p581_p5 = por %p580_p0, %p579_p1 }
 0x1d3   : > { %p577_p13 = pneg %p576_p11 }
 0x1d4   : > { %p583_p10 = por %p582_p6, %p581_p5 }
 0x1d6   : > { %p584_p12 = pnand %p583_p10, %p577_p13 }
 0x1d8   : > { %587 = shalt.err (!%p584_p12)
}
 0x1d9   : > { %s637_s6 = smov 128   ;;  %s638_s7 = smov 8  }
 0x1da   : > { %464 = dma.vmem_to_hbm [thread:$0]  (%p823_p9), %s764_s10, 256, %s762_s19, %s768_s16, %s637_s6, %s637_s6, %s638_s7  }
 0x1db PF: > { %p476_p2 = scmp.ge.s32.totalorder %s626_s15, 2  ;;  %s360_s8 = sand.u32 1, %s614_s12  }
 0x1dc   : > { %p824_p3 = scmp.ne.s32.totalorder %s817_s23, 0  ;;  %s361_s9 = scalar_lea.sflag [#allocation4], %s360_s8 }
 0x1de   : > { %p471_p4 = pnand %p476_p2, %p824_p3 }
 0x1e0   : > { %609 = dma.done.wait (!%p471_p4), %s361_s9, 256  }
 0x1e1   : > { %611 = vsyncadd (!%p471_p4), %s361_s9, 4294967040  ;;  %p14_p7 = scmp.ge.s32.totalorder %s684_s18, 4   ;;  %s825_s12 = smov %s618_s13 }
 0x1e2   : > { %s826_s13 = smov %s622_s14  ;;  %s827_s14 = smov %s695_s21 }
 0x1e3   : > { %s828_s15 = smov %s684_s18  ;;  %16 = sbr.rel (!%p14_p7) target bundleno = 4 (0x4), region = 72 }
 0x1ea   :  { %366 = vsyncpa [#allocation3], 1 }
 0x1eb   :  { %368 = vsyncpa [#allocation3 + $0x1], 1 }
 0x1ec   :  { %369 = vsyncpa [#allocation4], 1 }
 0x1ed   :  { %371 = vsyncpa [#allocation4 + $0x1], 1 }

</bundles_post_ra>
